<compile_context>
chip_gen: v7x
topology: tpu7x:2x2x1
jax: 0.10.0
libtpu: 0.0.40
codegen_flags: <defaults>
</compile_context>

<pallas_src>
import functools

import jax
import jax.numpy as jnp
from jax.experimental import pallas as pl
from jax.experimental.pallas import tpu as pltpu


def _roll_left(a, d, lanes):
    """s[:, q] = a[:, (q + d) % lanes]; wraparound lands in the don't-care tail."""
    if d == 0:
        return a
    return pltpu.roll(a, shift=lanes - d, axis=1)


def _cnn_fused_kernel(x_ref, w1_ref, w2_ref, w3_ref,
                      b1_ref, b2_ref, b3_ref, alpha_ref,
                      o_ref, patches_ref,
                      *, frame_w, lanes, ksizes):
    """All three conv+BN+PReLU layers fused; activations stay on-chip."""
    k1, k2, k3 = ksizes

    def prelu(y, alpha):
        return jnp.where(y > 0.0, y, alpha * y)

    # ---------------- Layer 1: C_in = 1 -> pure VPU broadcast-FMAs. ----------
    a0 = x_ref[...]                                    # [1, lanes]
    w1 = w1_ref[...]                                   # [oc1, kh*kw]
    oc1 = w1.shape[0]
    # Sublane-broadcast once so every roll operates on a standard [oc1, lanes]
    # tile (same roll pattern as layers 2/3).
    a0b = jnp.broadcast_to(a0, (oc1, lanes))
    kh, kw = k1
    acc = jnp.zeros((oc1, lanes), jnp.float32)
    t = 0
    for ki in range(kh):
        for kj in range(kw):
            rolled = _roll_left(a0b, ki * frame_w + kj, lanes)
            acc = acc + w1[:, t:t + 1] * rolled        # [oc1,1] * [oc1,lanes]
            t += 1
    a1 = prelu(acc + b1_ref[...], alpha_ref[0])        # [oc1, lanes]

    # ------- Layers 2/3: VMEM-staged im2col + one MXU matmul per layer. ------
    def conv_mxu(a, w_ref, b_ref, alpha, kh, kw):
        c = a.shape[0]
        t = 0
        for ki in range(kh):
            for kj in range(kw):
                # One aligned c-row store per tap; the full patch matrix never
                # has to live in vregs.
                patches_ref[t * c:(t + 1) * c, :] = _roll_left(
                    a, ki * frame_w + kj, lanes)
                t += 1
        y = jnp.dot(w_ref[...], patches_ref[0:kh * kw * c, :],
                    preferred_element_type=jnp.float32)
        return prelu(y + b_ref[...], alpha)

    a2 = conv_mxu(a1, w2_ref, b2_ref, alpha_ref[1], *k2)
    a3 = conv_mxu(a2, w3_ref, b3_ref, alpha_ref[2], *k3)   # [oc3, lanes]

    # Single lane-dense (512-wide) unmasked store; batch un-interleave happens
    # in the XLA epilogue.
    o_ref[...] = a3


def _prep_layer(w, conv_b, gamma, beta, run_mean, run_var, alpha, eps):
    """Fold eval-mode BN (true running statistics) into conv weight/bias."""
    oc, cin, kh, kw = w.shape
    scale = (gamma / jnp.sqrt(run_var.astype(jnp.float32) + eps)).astype(jnp.float32)
    wp = w.astype(jnp.float32) * scale[:, None, None, None]
    # Row order of the in-kernel patch matrix is ((ki, kj) major, c minor).
    wp = wp.transpose(0, 2, 3, 1).reshape(oc, kh * kw * cin)
    bp = (beta.astype(jnp.float32)
          + scale * (conv_b.astype(jnp.float32) - run_mean.astype(jnp.float32))
          ).reshape(oc, 1)
    al = jnp.asarray(alpha, jnp.float32).reshape(())
    return wp, bp, al, (kh, kw)


def cnn_forward(x, params, eps=1e-5):
    N, c_in, H, W = x.shape
    assert c_in == 1, "module fixes in_channels=1"
    P = H * W
    lanes = N * P

    wp1, bp1, al1, k1 = _prep_layer(*params["conv1"], eps)
    wp2, bp2, al2, k2 = _prep_layer(*params["conv2"], eps)
    wp3, bp3, al3, k3 = _prep_layer(*params["conv3"], eps)
    alphas = jnp.stack([al1, al2, al3])                 # (3,) f32 -> SMEM

    oc1, oc2, oc3 = wp1.shape[0], wp2.shape[0], wp3.shape[0]
    oh = H - (k1[0] - 1) - (k2[0] - 1) - (k3[0] - 1)
    ow = W - (k1[1] - 1) - (k2[1] - 1) - (k3[1] - 1)
    assert oh > 0 and ow > 0

    # Wraparound-safety invariant of the fixed-frame roll-based im2col:
    # the furthest lane any *valid* output position reads must stay inside the
    # sample's own H*W frame (holds only for VALID conv, stride 1, no dilation).
    max_read = ((oh - 1) * W + (ow - 1)
                + sum((kh - 1) * W + (kw - 1) for kh, kw in (k1, k2, k3)))
    assert max_read < P, (max_read, P)

    # Lane-dense activation layout [C, N*H*W]; column = n*P + h*W + w.
    x2d = x.transpose(1, 0, 2, 3).reshape(c_in, lanes).astype(jnp.float32)

    patch_rows = max(k2[0] * k2[1] * oc1, k3[0] * k3[1] * oc2)

    kernel = functools.partial(
        _cnn_fused_kernel, frame_w=W, lanes=lanes, ksizes=(k1, k2, k3))

    flops = 2 * lanes * (oc1 * k1[0] * k1[1]
                         + oc2 * k2[0] * k2[1] * oc1
                         + oc3 * k3[0] * k3[1] * oc2)
    bytes_accessed = 4 * (x2d.size + wp1.size + wp2.size + wp3.size
                          + bp1.size + bp2.size + bp3.size + 3 + oc3 * lanes)

    res = pl.pallas_call(
        kernel,
        out_shape=jax.ShapeDtypeStruct((oc3, lanes), jnp.float32),
        in_specs=[
            pl.BlockSpec(x2d.shape, lambda: (0, 0)),
            pl.BlockSpec(wp1.shape, lambda: (0, 0)),
            pl.BlockSpec(wp2.shape, lambda: (0, 0)),
            pl.BlockSpec(wp3.shape, lambda: (0, 0)),
            pl.BlockSpec(bp1.shape, lambda: (0, 0)),
            pl.BlockSpec(bp2.shape, lambda: (0, 0)),
            pl.BlockSpec(bp3.shape, lambda: (0, 0)),
            pl.BlockSpec(memory_space=pltpu.MemorySpace.SMEM),
        ],
        out_specs=pl.BlockSpec((oc3, lanes), lambda: (0, 0)),
        scratch_shapes=[pltpu.VMEM((patch_rows, lanes), jnp.float32)],
        cost_estimate=pl.CostEstimate(flops=int(flops), transcendentals=0,
                                      bytes_accessed=int(bytes_accessed)),
    )(x2d, wp1, wp2, wp3, bp1, bp2, bp3, alphas)

    # Un-interleave the batch and crop the valid OHxOW window, then flatten
    # NCHW-style (tiny XLA epilogue; everything heavy ran inside the kernel).
    out = (res.reshape(oc3, N, H, W)
              .transpose(1, 0, 2, 3)[:, :, :oh, :ow]
              .reshape(N, oc3 * oh * ow))
    return out


def reference_forward(x, params, eps=1e-5):
    """Pure-JAX reference (eval-mode BN with running stats, PReLU, no dropout)."""
    a = x.astype(jnp.float32)
    for name in ("conv1", "conv2", "conv3"):
        w, b, gamma, beta, run_mean, run_var, alpha = params[name]
        a = jax.lax.conv_general_dilated(
            a, w.astype(jnp.float32), window_strides=(1, 1), padding="VALID",
            dimension_numbers=("NCHW", "OIHW", "NCHW"),
            precision=jax.lax.Precision.HIGHEST)
        a = a + b[None, :, None, None]
        scale = gamma / jnp.sqrt(run_var + eps)
        a = (a - run_mean[None, :, None, None]) * scale[None, :, None, None] \
            + beta[None, :, None, None]
        a = jnp.where(a > 0.0, a, alpha * a)
    return a.reshape(a.shape[0], -1)


def init_params(key, oc1=8, oc2=8, oc3=8, k1=3, k2=3, k3=3):
    keys = iter(jax.random.split(key, 18))

    def layer(in_c, out_c, ks):
        w = 0.1 * jax.random.normal(next(keys), (out_c, in_c, ks, ks), jnp.float32)
        b = 0.1 * jax.random.normal(next(keys), (out_c,), jnp.float32)
        gamma = 1.0 + 0.1 * jax.random.normal(next(keys), (out_c,), jnp.float32)
        beta = 0.1 * jax.random.normal(next(keys), (out_c,), jnp.float32)
        run_mean = 0.1 * jax.random.normal(next(keys), (out_c,), jnp.float32)
        run_var = 1.0 + 0.2 * jax.random.uniform(next(keys), (out_c,), jnp.float32)
        alpha = jnp.float32(0.25)   # PReLU default init (single shared parameter)
        return (w, b, gamma, beta, run_mean, run_var, alpha)

    return {
        "conv1": layer(1, oc1, k1),
        "conv2": layer(oc1, oc2, k2),
        "conv3": layer(oc2, oc3, k3),
    }


if __name__ == "__main__":
    key = jax.random.PRNGKey(0)
    k_x, k_p = jax.random.split(key)

    # Module fixes in_channels=1; small deterministic input.
    x = jax.random.normal(k_x, (2, 1, 16, 16), jnp.float32)
    params = init_params(k_p)

    fwd = jax.jit(functools.partial(cnn_forward, params=params))
    out = jax.block_until_ready(fwd(x))

    # 16 -> 14 -> 12 -> 10 spatial, 8 channels -> flatten to (2, 800)
    assert out.shape == (2, 8 * 10 * 10), out.shape
    assert bool(jnp.all(jnp.isfinite(out)))

    ref = jax.block_until_ready(
        jax.jit(functools.partial(reference_forward, params=params))(x))
    max_err = float(jnp.max(jnp.abs(out - ref)))
    # Kernel matmuls run at default (bf16-based) MXU precision vs. the f32
    # HIGHEST-precision reference; at these magnitudes errors stay ~1e-3.
    assert jnp.allclose(out, ref, atol=1e-2, rtol=1e-2), max_err

    print("KERNEL_OK")
</pallas_src>

<mosaic_0001>
module attributes {stable_mosaic.version = 11 : i64} {
  func.func @_cnn_fused_kernel(%arg0: memref<1x512xf32, #tpu.memory_space<vmem>>, %arg1: memref<8x9xf32, #tpu.memory_space<vmem>>, %arg2: memref<8x72xf32, #tpu.memory_space<vmem>>, %arg3: memref<8x72xf32, #tpu.memory_space<vmem>>, %arg4: memref<8x1xf32, #tpu.memory_space<vmem>>, %arg5: memref<8x1xf32, #tpu.memory_space<vmem>>, %arg6: memref<8x1xf32, #tpu.memory_space<vmem>>, %arg7: memref<3xf32, #tpu.memory_space<smem>>, %arg8: memref<8x512xf32, #tpu.memory_space<vmem>>, %arg9: memref<72x512xf32, #tpu.memory_space<vmem>>) attributes {dimension_semantics = [], scalar_prefetch = 0 : i64, scratch_operands = 1 : i64, tpu.core_type = #tpu.core_type<tc>} {
    %c0 = arith.constant 0 : index
    %c0_0 = arith.constant 0 : index
    %0 = vector.load %arg0[%c0, %c0_0] : memref<1x512xf32, #tpu.memory_space<vmem>>, vector<1x512xf32>
    %c0_1 = arith.constant 0 : index
    %c0_2 = arith.constant 0 : index
    %1 = vector.load %arg1[%c0_1, %c0_2] : memref<8x9xf32, #tpu.memory_space<vmem>>, vector<8x9xf32>
    %2 = vector.shape_cast %0 : vector<1x512xf32> to vector<1x512xf32>
    %3 = vector.broadcast %2 : vector<1x512xf32> to vector<8x512xf32>
    %cst = arith.constant 0.000000e+00 : f32
    %4 = vector.broadcast %cst : f32 to vector<8x512xf32>
    %5 = vector.extract_strided_slice %1 {offsets = [0, 0], sizes = [8, 1], strides = [1, 1]} : vector<8x9xf32> to vector<8x1xf32>
    %6 = vector.broadcast %5 : vector<8x1xf32> to vector<8x512xf32>
    %7 = arith.mulf %6, %3 : vector<8x512xf32>
    %8 = arith.addf %4, %7 : vector<8x512xf32>
    %c511_i32 = arith.constant 511 : i32
    %9 = tpu.dynamic_rotate %3 by %c511_i32 dim 1 : vector<8x512xf32>, i32 -> vector<8x512xf32>
    %10 = vector.extract_strided_slice %1 {offsets = [0, 1], sizes = [8, 1], strides = [1, 1]} : vector<8x9xf32> to vector<8x1xf32>
    %11 = vector.broadcast %10 : vector<8x1xf32> to vector<8x512xf32>
    %12 = arith.mulf %11, %9 : vector<8x512xf32>
    %13 = arith.addf %8, %12 : vector<8x512xf32>
    %c510_i32 = arith.constant 510 : i32
    %14 = tpu.dynamic_rotate %3 by %c510_i32 dim 1 : vector<8x512xf32>, i32 -> vector<8x512xf32>
    %15 = vector.extract_strided_slice %1 {offsets = [0, 2], sizes = [8, 1], strides = [1, 1]} : vector<8x9xf32> to vector<8x1xf32>
    %16 = vector.broadcast %15 : vector<8x1xf32> to vector<8x512xf32>
    %17 = arith.mulf %16, %14 : vector<8x512xf32>
    %18 = arith.addf %13, %17 : vector<8x512xf32>
    %c496_i32 = arith.constant 496 : i32
    %19 = tpu.dynamic_rotate %3 by %c496_i32 dim 1 : vector<8x512xf32>, i32 -> vector<8x512xf32>
    %20 = vector.extract_strided_slice %1 {offsets = [0, 3], sizes = [8, 1], strides = [1, 1]} : vector<8x9xf32> to vector<8x1xf32>
    %21 = vector.broadcast %20 : vector<8x1xf32> to vector<8x512xf32>
    %22 = arith.mulf %21, %19 : vector<8x512xf32>
    %23 = arith.addf %18, %22 : vector<8x512xf32>
    %c495_i32 = arith.constant 495 : i32
    %24 = tpu.dynamic_rotate %3 by %c495_i32 dim 1 : vector<8x512xf32>, i32 -> vector<8x512xf32>
    %25 = vector.extract_strided_slice %1 {offsets = [0, 4], sizes = [8, 1], strides = [1, 1]} : vector<8x9xf32> to vector<8x1xf32>
    %26 = vector.broadcast %25 : vector<8x1xf32> to vector<8x512xf32>
    %27 = arith.mulf %26, %24 : vector<8x512xf32>
    %28 = arith.addf %23, %27 : vector<8x512xf32>
    %c494_i32 = arith.constant 494 : i32
    %29 = tpu.dynamic_rotate %3 by %c494_i32 dim 1 : vector<8x512xf32>, i32 -> vector<8x512xf32>
    %30 = vector.extract_strided_slice %1 {offsets = [0, 5], sizes = [8, 1], strides = [1, 1]} : vector<8x9xf32> to vector<8x1xf32>
    %31 = vector.broadcast %30 : vector<8x1xf32> to vector<8x512xf32>
    %32 = arith.mulf %31, %29 : vector<8x512xf32>
    %33 = arith.addf %28, %32 : vector<8x512xf32>
    %c480_i32 = arith.constant 480 : i32
    %34 = tpu.dynamic_rotate %3 by %c480_i32 dim 1 : vector<8x512xf32>, i32 -> vector<8x512xf32>
    %35 = vector.extract_strided_slice %1 {offsets = [0, 6], sizes = [8, 1], strides = [1, 1]} : vector<8x9xf32> to vector<8x1xf32>
    %36 = vector.broadcast %35 : vector<8x1xf32> to vector<8x512xf32>
    %37 = arith.mulf %36, %34 : vector<8x512xf32>
    %38 = arith.addf %33, %37 : vector<8x512xf32>
    %c479_i32 = arith.constant 479 : i32
    %39 = tpu.dynamic_rotate %3 by %c479_i32 dim 1 : vector<8x512xf32>, i32 -> vector<8x512xf32>
    %40 = vector.extract_strided_slice %1 {offsets = [0, 7], sizes = [8, 1], strides = [1, 1]} : vector<8x9xf32> to vector<8x1xf32>
    %41 = vector.broadcast %40 : vector<8x1xf32> to vector<8x512xf32>
    %42 = arith.mulf %41, %39 : vector<8x512xf32>
    %43 = arith.addf %38, %42 : vector<8x512xf32>
    %c478_i32 = arith.constant 478 : i32
    %44 = tpu.dynamic_rotate %3 by %c478_i32 dim 1 : vector<8x512xf32>, i32 -> vector<8x512xf32>
    %45 = vector.extract_strided_slice %1 {offsets = [0, 8], sizes = [8, 1], strides = [1, 1]} : vector<8x9xf32> to vector<8x1xf32>
    %46 = vector.broadcast %45 : vector<8x1xf32> to vector<8x512xf32>
    %47 = arith.mulf %46, %44 : vector<8x512xf32>
    %48 = arith.addf %43, %47 : vector<8x512xf32>
    %c0_3 = arith.constant 0 : index
    %c0_4 = arith.constant 0 : index
    %49 = vector.load %arg4[%c0_3, %c0_4] : memref<8x1xf32, #tpu.memory_space<vmem>>, vector<8x1xf32>
    %50 = vector.broadcast %49 : vector<8x1xf32> to vector<8x512xf32>
    %51 = arith.addf %48, %50 : vector<8x512xf32>
    %c0_5 = arith.constant 0 : index
    %52 = memref.load %arg7[%c0_5] : memref<3xf32, #tpu.memory_space<smem>>
    %cst_6 = arith.constant 0.000000e+00 : f32
    %53 = vector.broadcast %cst_6 : f32 to vector<8x512xf32>
    %54 = arith.cmpf ogt, %51, %53 : vector<8x512xf32>
    %55 = vector.broadcast %52 : f32 to vector<8x512xf32>
    %56 = arith.mulf %55, %51 : vector<8x512xf32>
    %57 = arith.select %54, %51, %56 : vector<8x512xi1>, vector<8x512xf32>
    %c1 = arith.constant 1 : index
    %58 = memref.load %arg7[%c1] : memref<3xf32, #tpu.memory_space<smem>>
    %c0_7 = arith.constant 0 : index
    %c0_8 = arith.constant 0 : index
    %59 = vector.load %arg9[%c0_7, %c0_8] : memref<72x512xf32, #tpu.memory_space<vmem>>, vector<8x512xf32>
    tpu.vector_store %arg9[%c0_7, %c0_8], %57 {strides = array<i32>} : memref<72x512xf32, #tpu.memory_space<vmem>>, vector<8x512xf32>,
    %c511_i32_9 = arith.constant 511 : i32
    %60 = tpu.dynamic_rotate %57 by %c511_i32_9 dim 1 : vector<8x512xf32>, i32 -> vector<8x512xf32>
    %c8 = arith.constant 8 : index
    %c0_10 = arith.constant 0 : index
    %61 = vector.load %arg9[%c8, %c0_10] : memref<72x512xf32, #tpu.memory_space<vmem>>, vector<8x512xf32>
    tpu.vector_store %arg9[%c8, %c0_10], %60 {strides = array<i32>} : memref<72x512xf32, #tpu.memory_space<vmem>>, vector<8x512xf32>,
    %c510_i32_11 = arith.constant 510 : i32
    %62 = tpu.dynamic_rotate %57 by %c510_i32_11 dim 1 : vector<8x512xf32>, i32 -> vector<8x512xf32>
    %c16 = arith.constant 16 : index
    %c0_12 = arith.constant 0 : index
    %63 = vector.load %arg9[%c16, %c0_12] : memref<72x512xf32, #tpu.memory_space<vmem>>, vector<8x512xf32>
    tpu.vector_store %arg9[%c16, %c0_12], %62 {strides = array<i32>} : memref<72x512xf32, #tpu.memory_space<vmem>>, vector<8x512xf32>,
    %c496_i32_13 = arith.constant 496 : i32
    %64 = tpu.dynamic_rotate %57 by %c496_i32_13 dim 1 : vector<8x512xf32>, i32 -> vector<8x512xf32>
    %c24 = arith.constant 24 : index
    %c0_14 = arith.constant 0 : index
    %65 = vector.load %arg9[%c24, %c0_14] : memref<72x512xf32, #tpu.memory_space<vmem>>, vector<8x512xf32>
    tpu.vector_store %arg9[%c24, %c0_14], %64 {strides = array<i32>} : memref<72x512xf32, #tpu.memory_space<vmem>>, vector<8x512xf32>,
    %c495_i32_15 = arith.constant 495 : i32
    %66 = tpu.dynamic_rotate %57 by %c495_i32_15 dim 1 : vector<8x512xf32>, i32 -> vector<8x512xf32>
    %c32 = arith.constant 32 : index
    %c0_16 = arith.constant 0 : index
    %67 = vector.load %arg9[%c32, %c0_16] : memref<72x512xf32, #tpu.memory_space<vmem>>, vector<8x512xf32>
    tpu.vector_store %arg9[%c32, %c0_16], %66 {strides = array<i32>} : memref<72x512xf32, #tpu.memory_space<vmem>>, vector<8x512xf32>,
    %c494_i32_17 = arith.constant 494 : i32
    %68 = tpu.dynamic_rotate %57 by %c494_i32_17 dim 1 : vector<8x512xf32>, i32 -> vector<8x512xf32>
    %c40 = arith.constant 40 : index
    %c0_18 = arith.constant 0 : index
    %69 = vector.load %arg9[%c40, %c0_18] : memref<72x512xf32, #tpu.memory_space<vmem>>, vector<8x512xf32>
    tpu.vector_store %arg9[%c40, %c0_18], %68 {strides = array<i32>} : memref<72x512xf32, #tpu.memory_space<vmem>>, vector<8x512xf32>,
    %c480_i32_19 = arith.constant 480 : i32
    %70 = tpu.dynamic_rotate %57 by %c480_i32_19 dim 1 : vector<8x512xf32>, i32 -> vector<8x512xf32>
    %c48 = arith.constant 48 : index
    %c0_20 = arith.constant 0 : index
    %71 = vector.load %arg9[%c48, %c0_20] : memref<72x512xf32, #tpu.memory_space<vmem>>, vector<8x512xf32>
    tpu.vector_store %arg9[%c48, %c0_20], %70 {strides = array<i32>} : memref<72x512xf32, #tpu.memory_space<vmem>>, vector<8x512xf32>,
    %c479_i32_21 = arith.constant 479 : i32
    %72 = tpu.dynamic_rotate %57 by %c479_i32_21 dim 1 : vector<8x512xf32>, i32 -> vector<8x512xf32>
    %c56 = arith.constant 56 : index
    %c0_22 = arith.constant 0 : index
    %73 = vector.load %arg9[%c56, %c0_22] : memref<72x512xf32, #tpu.memory_space<vmem>>, vector<8x512xf32>
    tpu.vector_store %arg9[%c56, %c0_22], %72 {strides = array<i32>} : memref<72x512xf32, #tpu.memory_space<vmem>>, vector<8x512xf32>,
    %c478_i32_23 = arith.constant 478 : i32
    %74 = tpu.dynamic_rotate %57 by %c478_i32_23 dim 1 : vector<8x512xf32>, i32 -> vector<8x512xf32>
    %c64 = arith.constant 64 : index
    %c0_24 = arith.constant 0 : index
    %75 = vector.load %arg9[%c64, %c0_24] : memref<72x512xf32, #tpu.memory_space<vmem>>, vector<8x512xf32>
    tpu.vector_store %arg9[%c64, %c0_24], %74 {strides = array<i32>} : memref<72x512xf32, #tpu.memory_space<vmem>>, vector<8x512xf32>,
    %c0_25 = arith.constant 0 : index
    %c0_26 = arith.constant 0 : index
    %76 = vector.load %arg2[%c0_25, %c0_26] : memref<8x72xf32, #tpu.memory_space<vmem>>, vector<8x72xf32>
    %c0_27 = arith.constant 0 : index
    %c0_28 = arith.constant 0 : index
    %77 = vector.load %arg9[%c0_27, %c0_28] : memref<72x512xf32, #tpu.memory_space<vmem>>, vector<72x512xf32>
    %cst_29 = arith.constant dense<0.000000e+00> : vector<8x512xf32>
    %78 = tpu.matmul %76, %77, %cst_29 {dimension_numbers = #tpu.dot_dimension_numbers<[1], [0], [0], [1], [0, 0, 1, 1], [], []>} : vector<8x72xf32>, vector<72x512xf32>, vector<8x512xf32> -> vector<8x512xf32>
    %c0_30 = arith.constant 0 : index
    %c0_31 = arith.constant 0 : index
    %79 = vector.load %arg5[%c0_30, %c0_31] : memref<8x1xf32, #tpu.memory_space<vmem>>, vector<8x1xf32>
    %80 = vector.broadcast %79 : vector<8x1xf32> to vector<8x512xf32>
    %81 = arith.addf %78, %80 : vector<8x512xf32>
    %cst_32 = arith.constant 0.000000e+00 : f32
    %82 = vector.broadcast %cst_32 : f32 to vector<8x512xf32>
    %83 = arith.cmpf ogt, %81, %82 : vector<8x512xf32>
    %84 = vector.broadcast %58 : f32 to vector<8x512xf32>
    %85 = arith.mulf %84, %81 : vector<8x512xf32>
    %86 = arith.select %83, %81, %85 : vector<8x512xi1>, vector<8x512xf32>
    %c2 = arith.constant 2 : index
    %87 = memref.load %arg7[%c2] : memref<3xf32, #tpu.memory_space<smem>>
    %c0_33 = arith.constant 0 : index
    %c0_34 = arith.constant 0 : index
    %88 = vector.load %arg9[%c0_33, %c0_34] : memref<72x512xf32, #tpu.memory_space<vmem>>, vector<8x512xf32>
    tpu.vector_store %arg9[%c0_33, %c0_34], %86 {strides = array<i32>} : memref<72x512xf32, #tpu.memory_space<vmem>>, vector<8x512xf32>,
    %c511_i32_35 = arith.constant 511 : i32
    %89 = tpu.dynamic_rotate %86 by %c511_i32_35 dim 1 : vector<8x512xf32>, i32 -> vector<8x512xf32>
    %c8_36 = arith.constant 8 : index
    %c0_37 = arith.constant 0 : index
    %90 = vector.load %arg9[%c8_36, %c0_37] : memref<72x512xf32, #tpu.memory_space<vmem>>, vector<8x512xf32>
    tpu.vector_store %arg9[%c8_36, %c0_37], %89 {strides = array<i32>} : memref<72x512xf32, #tpu.memory_space<vmem>>, vector<8x512xf32>,
    %c510_i32_38 = arith.constant 510 : i32
    %91 = tpu.dynamic_rotate %86 by %c510_i32_38 dim 1 : vector<8x512xf32>, i32 -> vector<8x512xf32>
    %c16_39 = arith.constant 16 : index
    %c0_40 = arith.constant 0 : index
    %92 = vector.load %arg9[%c16_39, %c0_40] : memref<72x512xf32, #tpu.memory_space<vmem>>, vector<8x512xf32>
    tpu.vector_store %arg9[%c16_39, %c0_40], %91 {strides = array<i32>} : memref<72x512xf32, #tpu.memory_space<vmem>>, vector<8x512xf32>,
    %c496_i32_41 = arith.constant 496 : i32
    %93 = tpu.dynamic_rotate %86 by %c496_i32_41 dim 1 : vector<8x512xf32>, i32 -> vector<8x512xf32>
    %c24_42 = arith.constant 24 : index
    %c0_43 = arith.constant 0 : index
    %94 = vector.load %arg9[%c24_42, %c0_43] : memref<72x512xf32, #tpu.memory_space<vmem>>, vector<8x512xf32>
    tpu.vector_store %arg9[%c24_42, %c0_43], %93 {strides = array<i32>} : memref<72x512xf32, #tpu.memory_space<vmem>>, vector<8x512xf32>,
    %c495_i32_44 = arith.constant 495 : i32
    %95 = tpu.dynamic_rotate %86 by %c495_i32_44 dim 1 : vector<8x512xf32>, i32 -> vector<8x512xf32>
    %c32_45 = arith.constant 32 : index
    %c0_46 = arith.constant 0 : index
    %96 = vector.load %arg9[%c32_45, %c0_46] : memref<72x512xf32, #tpu.memory_space<vmem>>, vector<8x512xf32>
    tpu.vector_store %arg9[%c32_45, %c0_46], %95 {strides = array<i32>} : memref<72x512xf32, #tpu.memory_space<vmem>>, vector<8x512xf32>,
    %c494_i32_47 = arith.constant 494 : i32
    %97 = tpu.dynamic_rotate %86 by %c494_i32_47 dim 1 : vector<8x512xf32>, i32 -> vector<8x512xf32>
    %c40_48 = arith.constant 40 : index
    %c0_49 = arith.constant 0 : index
    %98 = vector.load %arg9[%c40_48, %c0_49] : memref<72x512xf32, #tpu.memory_space<vmem>>, vector<8x512xf32>
    tpu.vector_store %arg9[%c40_48, %c0_49], %97 {strides = array<i32>} : memref<72x512xf32, #tpu.memory_space<vmem>>, vector<8x512xf32>,
    %c480_i32_50 = arith.constant 480 : i32
    %99 = tpu.dynamic_rotate %86 by %c480_i32_50 dim 1 : vector<8x512xf32>, i32 -> vector<8x512xf32>
    %c48_51 = arith.constant 48 : index
    %c0_52 = arith.constant 0 : index
    %100 = vector.load %arg9[%c48_51, %c0_52] : memref<72x512xf32, #tpu.memory_space<vmem>>, vector<8x512xf32>
    tpu.vector_store %arg9[%c48_51, %c0_52], %99 {strides = array<i32>} : memref<72x512xf32, #tpu.memory_space<vmem>>, vector<8x512xf32>,
    %c479_i32_53 = arith.constant 479 : i32
    %101 = tpu.dynamic_rotate %86 by %c479_i32_53 dim 1 : vector<8x512xf32>, i32 -> vector<8x512xf32>
    %c56_54 = arith.constant 56 : index
    %c0_55 = arith.constant 0 : index
    %102 = vector.load %arg9[%c56_54, %c0_55] : memref<72x512xf32, #tpu.memory_space<vmem>>, vector<8x512xf32>
    tpu.vector_store %arg9[%c56_54, %c0_55], %101 {strides = array<i32>} : memref<72x512xf32, #tpu.memory_space<vmem>>, vector<8x512xf32>,
    %c478_i32_56 = arith.constant 478 : i32
    %103 = tpu.dynamic_rotate %86 by %c478_i32_56 dim 1 : vector<8x512xf32>, i32 -> vector<8x512xf32>
    %c64_57 = arith.constant 64 : index
    %c0_58 = arith.constant 0 : index
    %104 = vector.load %arg9[%c64_57, %c0_58] : memref<72x512xf32, #tpu.memory_space<vmem>>, vector<8x512xf32>
    tpu.vector_store %arg9[%c64_57, %c0_58], %103 {strides = array<i32>} : memref<72x512xf32, #tpu.memory_space<vmem>>, vector<8x512xf32>,
    %c0_59 = arith.constant 0 : index
    %c0_60 = arith.constant 0 : index
    %105 = vector.load %arg3[%c0_59, %c0_60] : memref<8x72xf32, #tpu.memory_space<vmem>>, vector<8x72xf32>
    %c0_61 = arith.constant 0 : index
    %c0_62 = arith.constant 0 : index
    %106 = vector.load %arg9[%c0_61, %c0_62] : memref<72x512xf32, #tpu.memory_space<vmem>>, vector<72x512xf32>
    %cst_63 = arith.constant dense<0.000000e+00> : vector<8x512xf32>
    %107 = tpu.matmul %105, %106, %cst_63 {dimension_numbers = #tpu.dot_dimension_numbers<[1], [0], [0], [1], [0, 0, 1, 1], [], []>} : vector<8x72xf32>, vector<72x512xf32>, vector<8x512xf32> -> vector<8x512xf32>
    %c0_64 = arith.constant 0 : index
    %c0_65 = arith.constant 0 : index
    %108 = vector.load %arg6[%c0_64, %c0_65] : memref<8x1xf32, #tpu.memory_space<vmem>>, vector<8x1xf32>
    %109 = vector.broadcast %108 : vector<8x1xf32> to vector<8x512xf32>
    %110 = arith.addf %107, %109 : vector<8x512xf32>
    %cst_66 = arith.constant 0.000000e+00 : f32
    %111 = vector.broadcast %cst_66 : f32 to vector<8x512xf32>
    %112 = arith.cmpf ogt, %110, %111 : vector<8x512xf32>
    %113 = vector.broadcast %87 : f32 to vector<8x512xf32>
    %114 = arith.mulf %113, %110 : vector<8x512xf32>
    %115 = arith.select %112, %110, %114 : vector<8x512xi1>, vector<8x512xf32>
    %c0_67 = arith.constant 0 : index
    %c0_68 = arith.constant 0 : index
    %116 = vector.load %arg8[%c0_67, %c0_68] : memref<8x512xf32, #tpu.memory_space<vmem>>, vector<8x512xf32>
    tpu.vector_store %arg8[%c0_67, %c0_68], %115 {strides = array<i32>} : memref<8x512xf32, #tpu.memory_space<vmem>>, vector<8x512xf32>,
    return
  }
}

</mosaic_0001>

<bundles_post_ra>
// kernel: cnn_forward.1
= control target key start
LH: loop header
LB: loop body
LE: loop exit
PB: predicated region body
PF: predicated region fallthrough
CT: control target
= control target key end

     0   :  { %13 = vsyncpa [#allocation4], 0  ;;  %s1747_s0 = inlined_call_operand.vmem [shape: f32[1,512], index: 0, kind: input, shape index: {}]   ;;  %s1748_s1 = inlined_call_operand.vmem [shape: f32[8,9], index: 1, kind: input, shape index: {}]   ;;  %s1749_s2 = inlined_call_operand.vmem [shape: f32[8,72], index: 2, kind: input, shape index: {}]   ;;  %s1750_s3 = inlined_call_operand.vmem [shape: f32[8,72], index: 3, kind: input, shape index: {}]   ;;  %s1751_s4 = inlined_call_operand.vmem [shape: f32[8,1], index: 4, kind: input, shape index: {}]   ;;  %s1752_s5 = inlined_call_operand.vmem [shape: f32[8,1], index: 5, kind: input, shape index: {}]   ;;  %s1753_s6 = inlined_call_operand.hbm [shape: f32[8,1], index: 6, kind: input, shape index: {}]   ;;  %s1754_s7 = inlined_call_operand.vmem [shape: f32[3], index: 7, kind: input, shape index: {}]   ;;  %s1755_s8 = inlined_call_operand.vmem [shape: f32[8,512], index: 8, kind: output, shape index: {}]  }
   0x1   :  { %14 = vsyncpa [#allocation5], 0  ;;  %s43_s29 = sshll.u32 %s1754_s7, 4  ;;  %s1273_s30 = smov [#allocation3]   ;;  %s44_s29 = int_to_ptr.vmem [resolvable:$true] %s43_s29 }
   0x2   :  { %s33_s9 = sshll.u32 %s1273_s30, 4  ;;  %s1235_s12 = scalar_lea.hbm %s1753_s6, 128  ;;  %s34_s9 = int_to_ptr.vmem [resolvable:$true] %s33_s9 }
   0x3   :  { %p1236_p0 = scmp.ne.s32.totalorder %s1753_s6, %s1235_s12  ;;  %p1239_p1 = scmp.lt.u32.totalorder %s1235_s12, %s1753_s6 }
   0x5   :  { %p1241_p2 = pnand %p1239_p1, %p1236_p0 }
   0x7   :  { %1244 = shalt.err (!%p1241_p2)
}
   0x8   :  { %s1245_s17 = scalar_lea.vmem %s34_s9, 128  ;;  %p1250_p4 = scmp.lt.s32.totalorder %s34_s9, %s34_s9 }
   0x9   :  { %p1246_p3 = scmp.ne.s32.totalorder %s34_s9, %s1245_s17  ;;  %p1251_p5 = scmp.lt.s32.totalorder %s1245_s17, %s1245_s17 }
   0xb   :  { %p1252_p6 = por %p1251_p5, %p1250_p4 }
   0xd   :  { %p1253_p7 = pnand %p1252_p6, %p1246_p3 }
   0xf   :  { %1256 = shalt.err (!%p1253_p7)
}
  0x10   :  { %36 = dma.hbm_to_vmem [thread:$0]  %s1753_s6, 128, %s34_s9, [#allocation4]  }
  0x11   :  { %s1257_s19 = scalar_lea.vmem %s44_s29, 16  ;;  %p1262_p9 = scmp.lt.s32.totalorder %s44_s29, %s44_s29 }
  0x12   :  { %p1258_p8 = scmp.ne.s32.totalorder %s44_s29, %s1257_s19  ;;  %p1263_p10 = scmp.lt.s32.totalorder %s1257_s19, %s1257_s19 }
  0x14   :  { %p1264_p11 = por %p1263_p10, %p1262_p9 }
  0x16   :  { %p1265_p12 = pnand %p1264_p11, %p1258_p8 }
  0x18   :  { %1268 = shalt.err (!%p1265_p12)
}
  0x19   :  { %s1274_s20 = smov [#allocation6]  }
  0x1a   :  { %46 = dma.vmem_to_smem %s44_s29, 16, %s1274_s20, [#allocation5]  }
  0x1b   :  { %1269 = dma.done.wait [#allocation4], 128  }
  0x1c   :  { %1270 = vsyncadd [#allocation4], 4294967168 }
  0x1d   :  { %1271 = dma.done.wait [#allocation5], 16  }
  0x1e   :  { %1272 = vsyncadd [#allocation5], 4294967280 }
  0x1f   :  { %53 = sfence }
  0x20   :  { %v55_v0 = vld [vmem:[%s1748_s1] sm:$0xff]  ;;  %v57_v1 = vlaneseq  ;;  %v1275_v2 = vmov 2   ;;  %v1276_v3 = vmov 1   ;;  %v1277_v9 = vmov 3   ;;  %s1279_s1 = smov 127   ;;  %s1283_s24 = smov 112  }
  0x21   :  { %1086 = vset.pattern.permute.xlu1 %v1275_v2  ;;  %1085 = vset.pattern.permute.xlu0 %v1276_v3  ;;  %v54_v5 = vld [vmem:[%s1747_s0] sm:$0xf]  ;;  %v1278_v13 = vmov 5   ;;  %v1280_v16 = vmov 4   ;;  %s1281_s0 = smov 126   ;;  %v1282_v17 = vmov 0  }
  0x22   :  { %131 = vperm.xlu1 %1086, %v55_v0   ;;  %106 = vperm.xlu0 %1085, %v55_v0   ;;  %v58_v4 = vshrl.u32 %v57_v1, 7  ;;  %v1284_v18 = vmov 6   ;;  %s1285_s25 = smov 111   ;;  %v1286_v19 = vmov 7   ;;  %s1287_s26 = smov 110   ;;  %v1288_v20 = vmov 8  }
  0x23   :  { %s1289_s27 = smov 96   ;;  %s1290_s28 = smov 95   ;;  %v292_v21 = vld [vmem:[%s1751_s4] sm:$0xff]  ;;  %v1446_v42 = vand.u32 127, %v57_v1  ;;  %vm492_vm12 = vcmask 588800  }
  0x24   :  { %v63_v6 = vsub.s32 1, %v58_v4  ;;  %v59_v7 = vsub.s32 0, %v58_v4  ;;  %v71_v8 = vsub.s32 3, %v58_v4  ;;  %v67_v12 = vsub.s32 2, %v58_v4  ;;  %s1291_s9 = smov 94   ;;  %s302_s4 = sld [smem:[#allocation6]] }
  0x25   :  { %vm100_vm0 = vcmp.lt.s32.totalorder %v1446_v42, 127  ;;  %vm125_vm1 = vcmp.lt.s32.totalorder %v1446_v42, 126  ;;  %vm150_vm2 = vcmp.lt.s32.totalorder %v1446_v42, 112  ;;  %vm175_vm3 = vcmp.lt.s32.totalorder %v1446_v42, 111  ;;  %s995_s13 = sld [smem:[#allocation6 + $0x1]]  ;;  %s998_s15 = sld [smem:[#allocation6 + $0x2]] }
  0x26   :  { %1087 = vset.pattern.permute.xlu1 %v1277_v9  ;;  %v1360_v10 = vrot.slane %v54_v5, %v63_v6  ;;  %v1362_v11 = vrot.slane %v54_v5, %v59_v7  ;;  %1089 = vset.pattern.permute.xlu0 %v1278_v13  ;;  %v1366_v14 = vrot.slane %v54_v5, %v71_v8  ;;  %vm200_vm4 = vcmp.lt.s32.totalorder %v1446_v42, 110 }
  0x27   :  { %156 = vperm.xlu1 %1087, %v55_v0   ;;  %v1370_v15 = vrot.slane %v54_v5, %v67_v12  ;;  %vm225_vm5 = vcmp.lt.s32.totalorder %v1446_v42, 96  ;;  %vm250_vm6 = vcmp.lt.s32.totalorder %v1446_v42, 95  ;;  %vm275_vm7 = vcmp.lt.s32.totalorder %v1446_v42, 94 }
  0x28   :  { %92 = vrot.lane.b32.xlu0 %v1360_v10, %s1279_s1 }
  0x2b   :  { %90 = vrot.lane.b32.xlu1 %v1362_v11, %s1279_s1 }
  0x2c   :  { %96 = vrot.lane.b32.xlu0 %v1366_v14, %s1279_s1  ;;  %1088 = vset.pattern.permute.xlu1 %v1280_v16 }
  0x2f   :  { %94 = vrot.lane.b32.xlu1 %v1370_v15, %s1279_s1 }
  0x30   :  { %117 = vrot.lane.b32.xlu0 %v1362_v11, %s1281_s0 }
  0x33   :  { %181 = vperm.xlu1 %1088, %v55_v0  }
  0x34   :  { %121 = vrot.lane.b32.xlu0 %v1370_v15, %s1281_s0 }
  0x37   :  { %119 = vrot.lane.b32.xlu1 %v1360_v10, %s1281_s0 }
  0x38   :  { %206 = vperm.xlu0 %1089, %v55_v0   ;;  %1234 = vset.pattern.permute.xlu1 %v1282_v17 }
  0x3b   :  { %123 = vrot.lane.b32.xlu1 %v1366_v14, %s1281_s0 }
  0x3c   :  { %146 = vrot.lane.b32.xlu0 %v1370_v15, %s1283_s24 }
  0x3d   :  { %1090 = vset.pattern.permute.xlu0 %v1284_v18 }
  0x3f   :  { %142 = vrot.lane.b32.xlu1 %v1362_v11, %s1283_s24 }
  0x40   :  { %231 = vperm.xlu0 %1090, %v55_v0  }
  0x43   :  { %144 = vrot.lane.b32.xlu1 %v1360_v10, %s1283_s24 }
  0x44   :  { %171 = vrot.lane.b32.xlu0 %v1370_v15, %s1285_s25 }
  0x45   :  { %1091 = vset.pattern.permute.xlu0 %v1286_v19 }
  0x47   :  { %148 = vrot.lane.b32.xlu1 %v1366_v14, %s1283_s24 }
  0x48   :  { %256 = vperm.xlu0 %1091, %v55_v0  }
  0x4b   :  { %167 = vrot.lane.b32.xlu1 %v1362_v11, %s1285_s25 }
  0x4c   :  { %196 = vrot.lane.b32.xlu0 %v1370_v15, %s1287_s26 }
  0x4d   :  { %1092 = vset.pattern.permute.xlu0 %v1288_v20 }
  0x4f   :  { %169 = vrot.lane.b32.xlu1 %v1360_v10, %s1285_s25 }
  0x50   :  { %281 = vperm.xlu0 %1092, %v55_v0  }
  0x53   :  { %173 = vrot.lane.b32.xlu1 %v1366_v14, %s1285_s25 }
  0x54   :  { %1093 = vset.pattern.permute.xlu0 %v1282_v17 }
  0x55   :  { %79 = vperm.xlu0 %1093, %v55_v0  }
  0x57   :  { %192 = vrot.lane.b32.xlu1 %v1362_v11, %s1287_s26 }
  0x59   :  { %221 = vrot.lane.b32.xlu0 %v1370_v15, %s1289_s27 }
  0x5b   :  { %194 = vrot.lane.b32.xlu1 %v1360_v10, %s1287_s26 }
  0x5d   :  { %242 = vrot.lane.b32.xlu0 %v1362_v11, %s1290_s28 }
  0x5f   :  { %198 = vrot.lane.b32.xlu1 %v1366_v14, %s1287_s26 }
  0x61   :  { %246 = vrot.lane.b32.xlu0 %v1370_v15, %s1290_s28 }
  0x63   :  { %217 = vrot.lane.b32.xlu1 %v1362_v11, %s1289_s27 }
  0x65   :  { %295 = vperm.xlu0 %1093, %v292_v21  }
  0x67   :  { %219 = vrot.lane.b32.xlu1 %v1360_v10, %s1289_s27 }
  0x69   :  { %271 = vrot.lane.b32.xlu0 %v1370_v15, %s1291_s9 }
  0x6b   :  { %223 = vrot.lane.b32.xlu1 %v1366_v14, %s1289_s27 }
  0x6f   :  { %244 = vrot.lane.b32.xlu1 %v1360_v10, %s1290_s28 }
  0x73   :  { %248 = vrot.lane.b32.xlu1 %v1366_v14, %s1290_s28 }
  0x77   :  { %267 = vrot.lane.b32.xlu1 %v1362_v11, %s1291_s9 }
  0x7b   :  { %269 = vrot.lane.b32.xlu1 %v1360_v10, %s1291_s9 }
  0x7f   :  { %273 = vrot.lane.b32.xlu1 %v1366_v14, %s1291_s9 }
  0xa1   :  { %v132_v22 = vpop.permute.xlu1 %131  ;;  %v107_v23 = vpop.permute.xlu0 %106 }
  0xa5   :  { %v93_v24 = vpop.permute.xlu0 %92 }
  0xa6   :  { %v1435_v25 = vpop.permute.xlu1 %156 }
  0xa9   :  { %v97_v26 = vpop.permute.xlu0 %96 }
  0xaa   :  { %v91_v27 = vpop.permute.xlu1 %90 }
  0xab   :  { %v103_v46 = vsel %vm100_vm0, %v91_v27, %v93_v24  ;;  %v104_v47 = vsel %vm100_vm0, %v97_v26, %v91_v27 }
  0xac   :  { %v109_v55 = vmul.f32 %v107_v23, %v103_v46  ;;  %v112_v56 = vmul.f32 %v107_v23, %v104_v47 }
  0xad   :  { %v118_v28 = vpop.permute.xlu0 %117 }
  0xae   :  { %v95_v29 = vpop.permute.xlu1 %94 }
  0xaf   :  { %v101_v49 = vsel %vm100_vm0, %v95_v29, %v97_v26  ;;  %v102_v50 = vsel %vm100_vm0, %v93_v24, %v95_v29 }
  0xb0   :  { %v110_v58 = vmul.f32 %v107_v23, %v102_v50  ;;  %v111_v59 = vmul.f32 %v107_v23, %v101_v49 }
  0xb1   :  { %v122_v30 = vpop.permute.xlu0 %121 }
  0xb2   :  { %v1437_v31 = vpop.permute.xlu1 %181 }
  0xb6   :  { %v120_v32 = vpop.permute.xlu1 %119 }
  0xb7   :  { %v1439_v33 = vpop.permute.xlu0 %206  ;;  %v127_v51 = vsel %vm125_vm1, %v120_v32, %v122_v30  ;;  %v128_v52 = vsel %vm125_vm1, %v118_v28, %v120_v32 }
  0xb8   :  { %v134_v62 = vmul.f32 %v132_v22, %v128_v52  ;;  %v135_v63 = vmul.f32 %v132_v22, %v127_v51 }
  0xba   :  { %v124_v34 = vpop.permute.xlu1 %123 }
  0xbb   :  { %v147_v35 = vpop.permute.xlu0 %146  ;;  %v126_v53 = vsel %vm125_vm1, %v122_v30, %v124_v34  ;;  %v129_v54 = vsel %vm125_vm1, %v124_v34, %v118_v28 }
  0xbc   :  { %v136_v0 = vmul.f32 %v132_v22, %v126_v53  ;;  %v137_v1 = vmul.f32 %v132_v22, %v129_v54 }
  0xbe   :  { %v143_v36 = vpop.permute.xlu1 %142 }
  0xbf   :  { %v1441_v37 = vpop.permute.xlu0 %231 }
  0xc2   :  { %v145_v38 = vpop.permute.xlu1 %144 }
  0xc3   :  { %v172_v39 = vpop.permute.xlu0 %171  ;;  %v152_v60 = vsel %vm150_vm2, %v145_v38, %v147_v35  ;;  %v153_v61 = vsel %vm150_vm2, %v143_v36, %v145_v38 }
  0xc4   :  { %v159_v7 = vmul.f32 %v1435_v25, %v153_v61  ;;  %v160_v8 = vmul.f32 %v1435_v25, %v152_v60 }
  0xc6   :  { %v149_v40 = vpop.permute.xlu1 %148 }
  0xc7   :  { %v1443_v41 = vpop.permute.xlu0 %256  ;;  %v151_v9 = vsel %vm150_vm2, %v147_v35, %v149_v40  ;;  %v154_v12 = vsel %vm150_vm2, %v149_v40, %v143_v36 }
  0xc8   :  { %v161_v24 = vmul.f32 %v1435_v25, %v151_v9  ;;  %v162_v26 = vmul.f32 %v1435_v25, %v154_v12 }
  0xca   :  { %v168_v43 = vpop.permute.xlu1 %167 }
  0xcb   :  { %v1448_v44 = vpop.permute.xlu0 %196 }
  0xce   :  { %v170_v45 = vpop.permute.xlu1 %169 }
  0xcf   :  { %v1456_v48 = vpop.permute.xlu0 %281 }
  0xd2   :  { %v174_v57 = vpop.permute.xlu1 %173 }
  0xd3   :  { %v179_v19 = vsel %vm175_vm3, %v174_v57, %v168_v43 }
  0xd4   :  { %v80_v2 = vpop.permute.xlu0 %79  ;;  %v187_v35 = vmul.f32 %v1437_v31, %v179_v19 }
  0xd5   :  { %v82_v3 = vmul.f32 %v80_v2, %v1362_v11  ;;  %v83_v4 = vmul.f32 %v80_v2, %v1360_v10  ;;  %v84_v5 = vmul.f32 %v80_v2, %v1370_v15  ;;  %v85_v6 = vmul.f32 %v80_v2, %v1366_v14 }
  0xd6   :  { %v193_v13 = vpop.permute.xlu1 %192  ;;  %v177_v10 = vsel %vm175_vm3, %v170_v45, %v172_v39  ;;  %v178_v14 = vsel %vm175_vm3, %v168_v43, %v170_v45  ;;  %v176_v15 = vsel %vm175_vm3, %v172_v39, %v174_v57 }
  0xd7   :  { %v113_v16 = vadd.f32 %v109_v55, %v82_v3  ;;  %v114_v17 = vadd.f32 %v110_v58, %v83_v4  ;;  %v115_v11 = vadd.f32 %v111_v59, %v84_v5  ;;  %v116_v18 = vadd.f32 %v112_v56, %v85_v6 }
  0xd8   :  { %v184_v28 = vmul.f32 %v1437_v31, %v178_v14  ;;  %v185_v29 = vmul.f32 %v1437_v31, %v177_v10  ;;  %v186_v34 = vmul.f32 %v1437_v31, %v176_v15  ;;  %v222_v47 = vpop.permute.xlu0 %221 }
  0xd9   :  { %v138_v20 = vadd.f32 %v134_v62, %v113_v16  ;;  %v139_v21 = vadd.f32 %v135_v63, %v114_v17  ;;  %v140_v22 = vadd.f32 %v136_v0, %v115_v11  ;;  %v141_v23 = vadd.f32 %v137_v1, %v116_v18 }
  0xda   :  { %v195_v27 = vpop.permute.xlu1 %194 }
  0xdb   :  { %v163_v30 = vadd.f32 %v159_v7, %v138_v20  ;;  %v164_v32 = vadd.f32 %v160_v8, %v139_v21  ;;  %v165_v36 = vadd.f32 %v161_v24, %v140_v22  ;;  %v166_v38 = vadd.f32 %v162_v26, %v141_v23 }
  0xdc   :  { %v243_v50 = vpop.permute.xlu0 %242  ;;  %v202_v31 = vsel %vm200_vm4, %v195_v27, %v1448_v44  ;;  %v203_v54 = vsel %vm200_vm4, %v193_v13, %v195_v27 }
  0xdd   :  { %v188_v39 = vadd.f32 %v184_v28, %v163_v30  ;;  %v189_v40 = vadd.f32 %v185_v29, %v164_v32  ;;  %v190_v43 = vadd.f32 %v186_v34, %v165_v36  ;;  %v191_v45 = vadd.f32 %v187_v35, %v166_v38 }
  0xde   :  { %v199_v46 = vpop.permute.xlu1 %198  ;;  %v209_v56 = vmul.f32 %v1439_v33, %v203_v54  ;;  %v210_v57 = vmul.f32 %v1439_v33, %v202_v31  ;;  %v307_v29 = vstv %s302_s4 }
  0xdf   :  { %v201_v63 = vsel %vm200_vm4, %v1448_v44, %v199_v46  ;;  %v204_v0 = vsel %vm200_vm4, %v199_v46, %v193_v13 }
  0xe0   :  { %v247_v52 = vpop.permute.xlu0 %246  ;;  %v213_v4 = vadd.f32 %v209_v56, %v188_v39  ;;  %v214_v5 = vadd.f32 %v210_v57, %v189_v40  ;;  %v211_v12 = vmul.f32 %v1439_v33, %v201_v63  ;;  %v212_v13 = vmul.f32 %v1439_v33, %v204_v0 }
  0xe2   :  { %v218_v25 = vpop.permute.xlu1 %217  ;;  %v215_v24 = vadd.f32 %v211_v12, %v190_v43  ;;  %v216_v26 = vadd.f32 %v212_v13, %v191_v45 }
  0xe4   :  { %v296_v60 = vpop.permute.xlu0 %295 }
  0xe6   :  { %v220_v49 = vpop.permute.xlu1 %219 }
  0xe7   :  { %v227_v58 = vsel %vm225_vm5, %v220_v49, %v222_v47  ;;  %v228_v59 = vsel %vm225_vm5, %v218_v25, %v220_v49 }
  0xe8   :  { %v234_v1 = vmul.f32 %v1441_v37, %v228_v59  ;;  %v235_v2 = vmul.f32 %v1441_v37, %v227_v58  ;;  %v272_v9 = vpop.permute.xlu0 %271  ;;  %v1292_v59 = vmov 0.0  }
  0xe9   :  { %560 = vmatprep.mubr.f32.mxu0 %v1292_v59  ;;  %631 = vmatprep.mubr.f32.mxu1 %v1292_v59 }
  0xea   :  { %v224_v51 = vpop.permute.xlu1 %223  ;;  %v238_v16 = vadd.f32 %v234_v1, %v213_v4  ;;  %v239_v17 = vadd.f32 %v235_v2, %v214_v5 }
  0xeb   :  { %v226_v6 = vsel %vm225_vm5, %v222_v47, %v224_v51  ;;  %v229_v7 = vsel %vm225_vm5, %v224_v51, %v218_v25 }
  0xec   :  { %v236_v14 = vmul.f32 %v1441_v37, %v226_v6  ;;  %v237_v15 = vmul.f32 %v1441_v37, %v229_v7 }
  0xee   :  { %v245_v53 = vpop.permute.xlu1 %244  ;;  %v240_v34 = vadd.f32 %v236_v14, %v215_v24  ;;  %v241_v35 = vadd.f32 %v237_v15, %v216_v26 }
  0xef   :  { %v252_v61 = vsel %vm250_vm6, %v245_v53, %v247_v52  ;;  %v253_v62 = vsel %vm250_vm6, %v243_v50, %v245_v53 }
  0xf0   :  { %v259_v44 = vmul.f32 %v1443_v41, %v253_v62  ;;  %v260_v8 = vmul.f32 %v1443_v41, %v252_v61 }
  0xf2   :  { %v249_v55 = vpop.permute.xlu1 %248  ;;  %v263_v33 = vadd.f32 %v259_v44, %v238_v16  ;;  %v264_v21 = vadd.f32 %v260_v8, %v239_v17 }
  0xf3   :  { %v251_v11 = vsel %vm250_vm6, %v247_v52, %v249_v55  ;;  %v254_v18 = vsel %vm250_vm6, %v249_v55, %v243_v50 }
  0xf4   :  { %v261_v27 = vmul.f32 %v1443_v41, %v251_v11  ;;  %v262_v28 = vmul.f32 %v1443_v41, %v254_v18 }
  0xf6   :  { %v268_v3 = vpop.permute.xlu1 %267  ;;  %v265_v46 = vadd.f32 %v261_v27, %v240_v34  ;;  %v266_v41 = vadd.f32 %v262_v28, %v241_v35 }
  0xfa   :  { %v270_v10 = vpop.permute.xlu1 %269 }
  0xfb   :  { %v277_v19 = vsel %vm275_vm7, %v270_v10, %v272_v9  ;;  %v278_v20 = vsel %vm275_vm7, %v268_v3, %v270_v10 }
  0xfc   :  { %v284_v22 = vmul.f32 %v1456_v48, %v278_v20  ;;  %v285_v23 = vmul.f32 %v1456_v48, %v277_v19 }
  0xfe   :  { %v288_v37 = vadd.f32 %v284_v22, %v263_v33  ;;  %v289_v30 = vadd.f32 %v285_v23, %v264_v21  ;;  %v274_v32 = vpop.permute.xlu1 %273 }
  0xff   :  { %v276_v36 = vsel %vm275_vm7, %v272_v9, %v274_v32  ;;  %v279_v38 = vsel %vm275_vm7, %v274_v32, %v268_v3 }
 0x100   :  { %v298_v39 = vadd.f32 %v296_v60, %v288_v37  ;;  %v299_v40 = vadd.f32 %v296_v60, %v289_v30  ;;  %v286_v43 = vmul.f32 %v1456_v48, %v276_v36  ;;  %v287_v45 = vmul.f32 %v1456_v48, %v279_v38 }
 0x102   :  { %vm303_vm8 = vcmp.gt.f32.partialorder %v298_v39, 0.0  ;;  %vm304_vm9 = vcmp.gt.f32.partialorder %v299_v40, 0.0  ;;  %v308_v47 = vmul.f32 %v307_v29, %v298_v39  ;;  %v309_v25 = vmul.f32 %v307_v29, %v299_v40 }
 0x103   :  { %v290_v49 = vadd.f32 %v286_v43, %v265_v46  ;;  %v291_v50 = vadd.f32 %v287_v45, %v266_v41 }
 0x104   :  { %v312_v51 = vsel %vm303_vm8, %v298_v39, %v308_v47  ;;  %v313_v52 = vsel %vm304_vm9, %v299_v40, %v309_v25 }
 0x105   :  { %v300_v53 = vadd.f32 %v296_v60, %v290_v49  ;;  %v301_v31 = vadd.f32 %v296_v60, %v291_v50  ;;  %v1094_v54 = vpack.i.bf16 %v313_v52, %v312_v51  ;;  %v486_v60 = vld [vmem:[%s1752_s5] sm:$0xff] }
 0x107   :  { %vm305_vm10 = vcmp.gt.f32.partialorder %v300_v53, 0.0  ;;  %vm306_vm11 = vcmp.gt.f32.partialorder %v301_v31, 0.0  ;;  %v310_v55 = vmul.f32 %v307_v29, %v300_v53  ;;  %v311_v56 = vmul.f32 %v307_v29, %v301_v31  ;;  %1095 = vrot.lane.b32.xlu0 %v1094_v54, %s1279_s1 }
 0x109   :  { %v314_v48 = vsel %vm305_vm10, %v300_v53, %v310_v55  ;;  %v315_v57 = vsel %vm306_vm11, %v301_v31, %v311_v56 }
 0x10a   :  { %v1099_v58 = vpack.i.bf16 %v315_v57, %v314_v48 }
 0x10b   :  { %1105 = vrot.lane.b32.xlu0 %v1094_v54, %s1281_s0 }
 0x10c   :  { %1100 = vrot.lane.b32.xlu1 %v1099_v58, %s1279_s1 }
 0x10f   :  { %1115 = vrot.lane.b32.xlu0 %v1094_v54, %s1283_s24 }
 0x110   :  { %1110 = vrot.lane.b32.xlu1 %v1099_v58, %s1281_s0 }
 0x113   :  { %1125 = vrot.lane.b32.xlu0 %v1094_v54, %s1285_s25 }
 0x114   :  { %1120 = vrot.lane.b32.xlu1 %v1099_v58, %s1283_s24 }
 0x117   :  { %1135 = vrot.lane.b32.xlu0 %v1094_v54, %s1287_s26 }
 0x118   :  { %1130 = vrot.lane.b32.xlu1 %v1099_v58, %s1285_s25 }
 0x11b   :  { %1145 = vrot.lane.b32.xlu0 %v1094_v54, %s1289_s27 }
 0x11c   :  { %1140 = vrot.lane.b32.xlu1 %v1099_v58, %s1287_s26 }
 0x11f   :  { %1155 = vrot.lane.b32.xlu0 %v1094_v54, %s1290_s28 }
 0x120   :  { %1150 = vrot.lane.b32.xlu1 %v1099_v58, %s1289_s27 }
 0x123   :  { %433 = vrot.lane.b32.xlu0 %v312_v51, %s1291_s9 }
 0x124   :  { %1160 = vrot.lane.b32.xlu1 %v1099_v58, %s1290_s28 }
 0x127   :  { %437 = vrot.lane.b32.xlu0 %v314_v48, %s1291_s9 }
 0x128   :  { %435 = vrot.lane.b32.xlu1 %v313_v52, %s1291_s9 }
 0x12b   :  { %489 = vperm.xlu0 %1093, %v486_v60  }
 0x12c   :  { %439 = vrot.lane.b32.xlu1 %v315_v57, %s1291_s9 }
 0x179   :  { %v1096_v61 = vpop.permute.xlu0 %1095 }
 0x17a   :  { %v1098_v62 = vunpack.i.h.bf16 %v1096_v61  ;;  %v1097_v63 = vunpack.i.l.bf16 %v1096_v61 }
 0x17c   :  { %v331_v4 = vsel %vm100_vm0, %v1097_v63, %v1098_v62 }
 0x17d   :  { %v1106_v0 = vpop.permute.xlu0 %1105  ;;  %v1003_v13 = vpack.c.bf16 %v331_v4, %v312_v51 }
 0x17e   :  { %v1101_v1 = vpop.permute.xlu1 %1100  ;;  %v1108_v15 = vunpack.i.h.bf16 %v1106_v0  ;;  %v1107_v19 = vunpack.i.l.bf16 %v1106_v0 }
 0x17f   :  { %v1103_v2 = vunpack.i.h.bf16 %v1101_v1  ;;  %v1102_v3 = vunpack.i.l.bf16 %v1101_v1 }
 0x180   :  { %v347_v34 = vsel %vm125_vm1, %v1107_v19, %v1108_v15 }
 0x181   :  { %v1116_v5 = vpop.permute.xlu0 %1115  ;;  %v330_v6 = vsel %vm100_vm0, %v1098_v62, %v1102_v3  ;;  %v332_v7 = vsel %vm100_vm0, %v1103_v2, %v1097_v63  ;;  %v329_v44 = vsel %vm100_vm0, %v1102_v3, %v1103_v2 }
 0x182   :  { %v1111_v8 = vpop.permute.xlu1 %1110  ;;  %v1001_v9 = vpack.c.bf16 %v330_v6, %v313_v52  ;;  %v1017_v12 = vpack.c.bf16 %v332_v7, %v315_v57  ;;  %v1019_v16 = vpack.c.bf16 %v329_v44, %v314_v48  ;;  %v1118_v17 = vunpack.i.h.bf16 %v1116_v5 }
 0x183   :  { %v1117_v11 = vunpack.i.l.bf16 %v1116_v5  ;;  %v1112_v18 = vunpack.i.l.bf16 %v1111_v8  ;;  %v1113_v10 = vunpack.i.h.bf16 %v1111_v8 }
 0x184   :  { %1002 = vmatprep.subr.bf16.mxu0 %v1001_v9  ;;  %1018 = vmatprep.subr.bf16.mxu1 %v1017_v12 }
 0x185   :  { %1004 = vmatpush1.bf16.msra.mxu0 %v1003_v13  ;;  %1020 = vmatpush1.bf16.msra.mxu1 %v1019_v16  ;;  %v1126_v14 = vpop.permute.xlu0 %1125  ;;  %v346_v22 = vsel %vm125_vm1, %v1108_v15, %v1112_v18  ;;  %v363_v23 = vsel %vm150_vm2, %v1117_v11, %v1118_v17  ;;  %v348_v27 = vsel %vm125_vm1, %v1113_v10, %v1107_v19 }
 0x186   :  { %v1121_v20 = vpop.permute.xlu1 %1120  ;;  %v345_v35 = vsel %vm125_vm1, %v1112_v18, %v1113_v10  ;;  %v1007_v36 = vpack.c.bf16 %v363_v23, %v347_v34  ;;  %v1128_v41 = vunpack.i.h.bf16 %v1126_v14  ;;  %v1127_v47 = vunpack.i.l.bf16 %v1126_v14 }
 0x187   :  { %v1123_v33 = vunpack.i.h.bf16 %v1121_v20  ;;  %v1122_v21 = vunpack.i.l.bf16 %v1121_v20 }
 0x188   :  { %v379_v60 = vsel %vm175_vm3, %v1127_v47, %v1128_v41 }
 0x189   :  { %v1136_v24 = vpop.permute.xlu0 %1135  ;;  %v362_v26 = vsel %vm150_vm2, %v1118_v17, %v1122_v21  ;;  %v364_v28 = vsel %vm150_vm2, %v1123_v33, %v1117_v11  ;;  %v361_v29 = vsel %vm150_vm2, %v1122_v21, %v1123_v33 }
 0x18a   :  { %v1131_v37 = vpop.permute.xlu1 %1130  ;;  %v1005_v30 = vpack.c.bf16 %v362_v26, %v346_v22  ;;  %v1021_v32 = vpack.c.bf16 %v364_v28, %v348_v27  ;;  %v1023_v38 = vpack.c.bf16 %v361_v29, %v345_v35  ;;  %v1138_v39 = vunpack.i.h.bf16 %v1136_v24  ;;  %v449_v27 = vld [vmem:[%s1749_s2] sm:$0xff] }
 0x18b   :  { %v1137_v40 = vunpack.i.l.bf16 %v1136_v24  ;;  %v1132_v43 = vunpack.i.l.bf16 %v1131_v37  ;;  %v1133_v45 = vunpack.i.h.bf16 %v1131_v37 }
 0x18c   :  { %1006 = vmatprep.subr.bf16.mxu0 %v1005_v30  ;;  %1022 = vmatprep.subr.bf16.mxu1 %v1021_v32  ;;  %v642_v30 = vstv %s995_s13 }
 0x18d   :  { %1008 = vmatpush1.bf16.msra.mxu0 %v1007_v36  ;;  %1024 = vmatpush1.bf16.msra.mxu1 %v1023_v38  ;;  %v1146_v46 = vpop.permute.xlu0 %1145  ;;  %v378_v51 = vsel %vm175_vm3, %v1128_v41, %v1132_v43  ;;  %v395_v52 = vsel %vm200_vm4, %v1137_v40, %v1138_v39  ;;  %v380_v54 = vsel %vm175_vm3, %v1133_v45, %v1127_v47 }
 0x18e   :  { %v1141_v25 = vpop.permute.xlu1 %1140  ;;  %v377_v61 = vsel %vm175_vm3, %v1132_v43, %v1133_v45  ;;  %v1011_v62 = vpack.c.bf16 %v395_v52, %v379_v60  ;;  %v1148_v5 = vunpack.i.h.bf16 %v1146_v46  ;;  %v1147_v6 = vunpack.i.l.bf16 %v1146_v46  ;;  %v821_v52 = vld [vmem:[#allocation3] sm:$0xff] }
 0x18f   :  { %v1143_v49 = vunpack.i.h.bf16 %v1141_v25  ;;  %v1142_v50 = vunpack.i.l.bf16 %v1141_v25 }
 0x190   :  { %v411_v20 = vsel %vm225_vm5, %v1147_v6, %v1148_v5 }
 0x191   :  { %v1156_v53 = vpop.permute.xlu0 %1155  ;;  %v394_v31 = vsel %vm200_vm4, %v1138_v39, %v1142_v50  ;;  %v396_v55 = vsel %vm200_vm4, %v1143_v49, %v1137_v40  ;;  %v393_v56 = vsel %vm200_vm4, %v1142_v50, %v1143_v49 }
 0x192   :  { %v1151_v48 = vpop.permute.xlu1 %1150  ;;  %v1009_v57 = vpack.c.bf16 %v394_v31, %v378_v51  ;;  %v1025_v58 = vpack.c.bf16 %v396_v55, %v380_v54  ;;  %v1027_v63 = vpack.c.bf16 %v393_v56, %v377_v61  ;;  %v1158_v0 = vunpack.i.h.bf16 %v1156_v53 }
 0x193   :  { %v1157_v1 = vunpack.i.l.bf16 %v1156_v53  ;;  %v1153_v2 = vunpack.i.h.bf16 %v1151_v48  ;;  %v1152_v3 = vunpack.i.l.bf16 %v1151_v48 }
 0x194   :  { %1010 = vmatprep.subr.bf16.mxu0 %v1009_v57  ;;  %1026 = vmatprep.subr.bf16.mxu1 %v1025_v58 }
 0x195   :  { %1012 = vmatpush1.bf16.msra.mxu0 %v1011_v62  ;;  %1028 = vmatpush1.bf16.msra.mxu1 %v1027_v63  ;;  %v434_v4 = vpop.permute.xlu0 %433  ;;  %v410_v9 = vsel %vm225_vm5, %v1148_v5, %v1152_v3  ;;  %v412_v12 = vsel %vm225_vm5, %v1153_v2, %v1147_v6  ;;  %v427_v13 = vsel %vm250_vm6, %v1157_v1, %v1158_v0 }
 0x196   :  { %v1161_v7 = vpop.permute.xlu1 %1160  ;;  %v409_v11 = vsel %vm225_vm5, %v1152_v3, %v1153_v2  ;;  %v1015_v21 = vpack.c.bf16 %v427_v13, %v411_v20 }
 0x197   :  { %v1163_v44 = vunpack.i.h.bf16 %v1161_v7  ;;  %v1162_v8 = vunpack.i.l.bf16 %v1161_v7 }
 0x199   :  { %v426_v16 = vsel %vm250_vm6, %v1158_v0, %v1162_v8  ;;  %v428_v17 = vsel %vm250_vm6, %v1163_v44, %v1157_v1  ;;  %v425_v18 = vsel %vm250_vm6, %v1162_v8, %v1163_v44  ;;  %v438_v10 = vpop.permute.xlu0 %437 }
 0x19a   :  { %v436_v14 = vpop.permute.xlu1 %435  ;;  %v1013_v15 = vpack.c.bf16 %v426_v16, %v410_v9  ;;  %v1029_v19 = vpack.c.bf16 %v428_v17, %v412_v12  ;;  %v1031_v33 = vpack.c.bf16 %v425_v18, %v409_v11 }
 0x19b   :  { %v442_v22 = vsel %vm275_vm7, %v436_v14, %v438_v10  ;;  %v443_v28 = vsel %vm275_vm7, %v434_v4, %v436_v14 }
 0x19c   :  { %1014 = vmatprep.subr.bf16.mxu0 %v1013_v15  ;;  %1030 = vmatprep.subr.bf16.mxu1 %v1029_v19 }
 0x19d   :  { %1016 = vmatpush1.bf16.msra.mxu0 %v1015_v21  ;;  %1032 = vmatpush1.bf16.msra.mxu1 %v1031_v33 }
 0x19e   :  { %v440_v23 = vpop.permute.xlu1 %439  ;;  %512 = vmatprep.subr.mxu0 %v442_v22 }
 0x19f   :  { %v444_v24 = vsel %vm275_vm7, %v440_v23, %v434_v4  ;;  %v441_v26 = vsel %vm275_vm7, %v438_v10, %v440_v23 }
 0x1a0   :  { %583 = vmatprep.subr.mxu1 %v444_v24 }
 0x1a1   :  { %513 = vmatpush1.msra.mxu0 %v443_v28  ;;  %584 = vmatpush1.msra.mxu1 %v441_v26 }
 0x1a2   :  { %996 = vmatmul.mubr.msk.f32.vlgmr.msra.gmra.mrb[0].mxu0 %vm492_vm12, %v449_v27  ;;  %997 = vmatmul.mubr.msk.f32.vlgmr.msra.gmra.mrb[0].mxu1 %vm492_vm12, %v449_v27 }
 0x1a3   :  { %894 = vmatprep.mubr.f32.mxu0 %v1292_v59  ;;  %965 = vmatprep.mubr.f32.mxu1 %v1292_v59 }
 0x1aa   :  { %v490_v29 = vpop.permute.xlu0 %489 }
 0x275   :  { %v562_v37 = vpop.f32.mrb[0].mxu0  ;;  %v633_v32 = vpop.f32.mrb[0].mxu1 }
 0x276   :  { %v563_v34 = vadd.f32 %v562_v37, %v490_v29  ;;  %v634_v35 = vadd.f32 %v633_v32, %v490_v29  ;;  %v564_v36 = vpop.f32.mrb[1].mxu0  ;;  %v635_v38 = vpop.f32.mrb[1].mxu1 }
 0x277   :  { %v565_v39 = vadd.f32 %v564_v36, %v490_v29  ;;  %v636_v40 = vadd.f32 %v635_v38, %v490_v29 }
 0x278   :  { %vm638_vm13 = vcmp.gt.f32.partialorder %v563_v34, 0.0  ;;  %v643_v43 = vmul.f32 %v642_v30, %v563_v34  ;;  %vm640_vm14 = vcmp.gt.f32.partialorder %v634_v35, 0.0  ;;  %v645_v45 = vmul.f32 %v642_v30, %v634_v35 }
 0x279   :  { %vm639_vm15 = vcmp.gt.f32.partialorder %v565_v39, 0.0  ;;  %v644_v46 = vmul.f32 %v642_v30, %v565_v39  ;;  %vm641_vm8 = vcmp.gt.f32.partialorder %v636_v40, 0.0  ;;  %v646_v41 = vmul.f32 %v642_v30, %v636_v40 }
 0x27a   :  { %v647_v59 = vsel %vm638_vm13, %v563_v34, %v643_v43  ;;  %v649_v47 = vsel %vm640_vm14, %v634_v35, %v645_v45 }
 0x27b   :  { %v648_v25 = vsel %vm639_vm15, %v565_v39, %v644_v46  ;;  %v650_v49 = vsel %vm641_vm8, %v636_v40, %v646_v41 }
 0x27c   :  { %v1164_v50 = vpack.i.bf16 %v648_v25, %v647_v59  ;;  %v1169_v51 = vpack.i.bf16 %v650_v49, %v649_v47 }
 0x27e   :  { %1165 = vrot.lane.b32.xlu1 %v1164_v50, %s1279_s1  ;;  %1170 = vrot.lane.b32.xlu0 %v1169_v51, %s1279_s1 }
 0x282   :  { %1175 = vrot.lane.b32.xlu1 %v1164_v50, %s1281_s0  ;;  %1180 = vrot.lane.b32.xlu0 %v1169_v51, %s1281_s0 }
 0x286   :  { %1185 = vrot.lane.b32.xlu1 %v1164_v50, %s1283_s24  ;;  %1190 = vrot.lane.b32.xlu0 %v1169_v51, %s1283_s24 }
 0x28a   :  { %1195 = vrot.lane.b32.xlu1 %v1164_v50, %s1285_s25  ;;  %1200 = vrot.lane.b32.xlu0 %v1169_v51, %s1285_s25 }
 0x28e   :  { %1205 = vrot.lane.b32.xlu1 %v1164_v50, %s1287_s26  ;;  %1210 = vrot.lane.b32.xlu0 %v1169_v51, %s1287_s26 }
 0x292   :  { %1215 = vrot.lane.b32.xlu1 %v1164_v50, %s1289_s27  ;;  %1220 = vrot.lane.b32.xlu0 %v1169_v51, %s1289_s27 }
 0x296   :  { %1225 = vrot.lane.b32.xlu1 %v1164_v50, %s1290_s28  ;;  %1230 = vrot.lane.b32.xlu0 %v1169_v51, %s1290_s28 }
 0x29a   :  { %768 = vrot.lane.b32.xlu1 %v647_v59, %s1291_s9  ;;  %770 = vrot.lane.b32.xlu0 %v648_v25, %s1291_s9 }
 0x29e   :  { %772 = vrot.lane.b32.xlu1 %v649_v47, %s1291_s9  ;;  %774 = vrot.lane.b32.xlu0 %v650_v49, %s1291_s9 }
 0x2a2   :  { %824 = vperm.xlu1 %1234, %v821_v52  }
 0x2f0   :  { %v1166_v53 = vpop.permute.xlu1 %1165  ;;  %v1171_v31 = vpop.permute.xlu0 %1170 }
 0x2f1   :  { %v1168_v54 = vunpack.i.h.bf16 %v1166_v53  ;;  %v1167_v55 = vunpack.i.l.bf16 %v1166_v53  ;;  %v1173_v56 = vunpack.i.h.bf16 %v1171_v31  ;;  %v1172_v48 = vunpack.i.l.bf16 %v1171_v31 }
 0x2f3   :  { %v666_v57 = vsel %vm100_vm0, %v1167_v55, %v1168_v54  ;;  %v664_v58 = vsel %vm100_vm0, %v1172_v48, %v1173_v56  ;;  %v665_v60 = vsel %vm100_vm0, %v1168_v54, %v1172_v48  ;;  %v667_v61 = vsel %vm100_vm0, %v1173_v56, %v1167_v55 }
 0x2f4   :  { %v1035_v62 = vpack.c.bf16 %v666_v57, %v647_v59  ;;  %v1051_v63 = vpack.c.bf16 %v664_v58, %v649_v47  ;;  %v1176_v0 = vpop.permute.xlu1 %1175  ;;  %v1181_v1 = vpop.permute.xlu0 %1180  ;;  %v1033_v2 = vpack.c.bf16 %v665_v60, %v648_v25  ;;  %v1049_v3 = vpack.c.bf16 %v667_v61, %v650_v49 }
 0x2f5   :  { %v1178_v4 = vunpack.i.h.bf16 %v1176_v0  ;;  %v1177_v5 = vunpack.i.l.bf16 %v1176_v0  ;;  %v1183_v6 = vunpack.i.h.bf16 %v1181_v1  ;;  %v1182_v7 = vunpack.i.l.bf16 %v1181_v1 }
 0x2f6   :  { %1034 = vmatprep.subr.bf16.mxu0 %v1033_v2  ;;  %1050 = vmatprep.subr.bf16.mxu1 %v1049_v3 }
 0x2f7   :  { %1036 = vmatpush1.bf16.msra.mxu0 %v1035_v62  ;;  %1052 = vmatpush1.bf16.msra.mxu1 %v1051_v63  ;;  %v682_v17 = vsel %vm125_vm1, %v1177_v5, %v1178_v4  ;;  %v680_v11 = vsel %vm125_vm1, %v1182_v7, %v1183_v6  ;;  %v681_v18 = vsel %vm125_vm1, %v1178_v4, %v1182_v7 }
 0x2f8   :  { %v1186_v44 = vpop.permute.xlu1 %1185  ;;  %v1191_v8 = vpop.permute.xlu0 %1190  ;;  %v683_v10 = vsel %vm125_vm1, %v1183_v6, %v1177_v5 }
 0x2f9   :  { %v1188_v9 = vunpack.i.h.bf16 %v1186_v44  ;;  %v1187_v12 = vunpack.i.l.bf16 %v1186_v44  ;;  %v1193_v13 = vunpack.i.h.bf16 %v1191_v8  ;;  %v1192_v16 = vunpack.i.l.bf16 %v1191_v8 }
 0x2fb   :  { %v698_v14 = vsel %vm150_vm2, %v1187_v12, %v1188_v9  ;;  %v696_v15 = vsel %vm150_vm2, %v1192_v16, %v1193_v13  ;;  %v697_v19 = vsel %vm150_vm2, %v1188_v9, %v1192_v16  ;;  %v699_v20 = vsel %vm150_vm2, %v1193_v13, %v1187_v12 }
 0x2fc   :  { %v1039_v33 = vpack.c.bf16 %v698_v14, %v682_v17  ;;  %v1055_v21 = vpack.c.bf16 %v696_v15, %v680_v11  ;;  %v1196_v22 = vpop.permute.xlu1 %1195  ;;  %v1201_v23 = vpop.permute.xlu0 %1200  ;;  %v1037_v24 = vpack.c.bf16 %v697_v19, %v681_v18  ;;  %v1053_v26 = vpack.c.bf16 %v699_v20, %v683_v10  ;;  %v784_v14 = vld [vmem:[%s1750_s3] sm:$0xff] }
 0x2fd   :  { %v1198_v27 = vunpack.i.h.bf16 %v1196_v22  ;;  %v1197_v28 = vunpack.i.l.bf16 %v1196_v22  ;;  %v1203_v29 = vunpack.i.h.bf16 %v1201_v23  ;;  %v1202_v37 = vunpack.i.l.bf16 %v1201_v23 }
 0x2fe   :  { %1038 = vmatprep.subr.bf16.mxu0 %v1037_v24  ;;  %1054 = vmatprep.subr.bf16.mxu1 %v1053_v26 }
 0x2ff   :  { %1040 = vmatpush1.bf16.msra.mxu0 %v1039_v33  ;;  %1056 = vmatpush1.bf16.msra.mxu1 %v1055_v21  ;;  %v714_v39 = vsel %vm175_vm3, %v1197_v28, %v1198_v27  ;;  %v712_v40 = vsel %vm175_vm3, %v1202_v37, %v1203_v29  ;;  %v713_v43 = vsel %vm175_vm3, %v1198_v27, %v1202_v37  ;;  %v976_v33 = vstv %s998_s15 }
 0x300   :  { %v1206_v30 = vpop.permute.xlu1 %1205  ;;  %v1211_v32 = vpop.permute.xlu0 %1210  ;;  %v715_v45 = vsel %vm175_vm3, %v1203_v29, %v1197_v28 }
 0x301   :  { %v1208_v34 = vunpack.i.h.bf16 %v1206_v30  ;;  %v1207_v35 = vunpack.i.l.bf16 %v1206_v30  ;;  %v1213_v36 = vunpack.i.h.bf16 %v1211_v32  ;;  %v1212_v38 = vunpack.i.l.bf16 %v1211_v32 }
 0x303   :  { %v730_v46 = vsel %vm200_vm4, %v1207_v35, %v1208_v34  ;;  %v728_v41 = vsel %vm200_vm4, %v1212_v38, %v1213_v36  ;;  %v729_v59 = vsel %vm200_vm4, %v1208_v34, %v1212_v38  ;;  %v731_v47 = vsel %vm200_vm4, %v1213_v36, %v1207_v35 }
 0x304   :  { %v1043_v25 = vpack.c.bf16 %v730_v46, %v714_v39  ;;  %v1059_v49 = vpack.c.bf16 %v728_v41, %v712_v40  ;;  %v1216_v50 = vpop.permute.xlu1 %1215  ;;  %v1221_v51 = vpop.permute.xlu0 %1220  ;;  %v1041_v52 = vpack.c.bf16 %v729_v59, %v713_v43  ;;  %v1057_v53 = vpack.c.bf16 %v731_v47, %v715_v45 }
 0x305   :  { %v1218_v31 = vunpack.i.h.bf16 %v1216_v50  ;;  %v1217_v54 = vunpack.i.l.bf16 %v1216_v50  ;;  %v1223_v55 = vunpack.i.h.bf16 %v1221_v51  ;;  %v1222_v56 = vunpack.i.l.bf16 %v1221_v51 }
 0x306   :  { %1042 = vmatprep.subr.bf16.mxu0 %v1041_v52  ;;  %1058 = vmatprep.subr.bf16.mxu1 %v1057_v53 }
 0x307   :  { %1044 = vmatpush1.bf16.msra.mxu0 %v1043_v25  ;;  %1060 = vmatpush1.bf16.msra.mxu1 %v1059_v49  ;;  %v746_v63 = vsel %vm225_vm5, %v1217_v54, %v1218_v31  ;;  %v744_v0 = vsel %vm225_vm5, %v1222_v56, %v1223_v55  ;;  %v745_v1 = vsel %vm225_vm5, %v1218_v31, %v1222_v56 }
 0x308   :  { %v1226_v48 = vpop.permute.xlu1 %1225  ;;  %v1231_v57 = vpop.permute.xlu0 %1230  ;;  %v747_v2 = vsel %vm225_vm5, %v1223_v55, %v1217_v54 }
 0x309   :  { %v1228_v58 = vunpack.i.h.bf16 %v1226_v48  ;;  %v1227_v60 = vunpack.i.l.bf16 %v1226_v48  ;;  %v1233_v61 = vunpack.i.h.bf16 %v1231_v57  ;;  %v1232_v62 = vunpack.i.l.bf16 %v1231_v57 }
 0x30b   :  { %v762_v3 = vsel %vm250_vm6, %v1227_v60, %v1228_v58  ;;  %v760_v4 = vsel %vm250_vm6, %v1232_v62, %v1233_v61  ;;  %v761_v5 = vsel %vm250_vm6, %v1228_v58, %v1232_v62  ;;  %v763_v6 = vsel %vm250_vm6, %v1233_v61, %v1227_v60 }
 0x30c   :  { %v1047_v7 = vpack.c.bf16 %v762_v3, %v746_v63  ;;  %v1063_v44 = vpack.c.bf16 %v760_v4, %v744_v0  ;;  %v769_v8 = vpop.permute.xlu1 %768  ;;  %v771_v9 = vpop.permute.xlu0 %770  ;;  %v1045_v12 = vpack.c.bf16 %v761_v5, %v745_v1  ;;  %v1061_v13 = vpack.c.bf16 %v763_v6, %v747_v2 }
 0x30d   :  { %v778_v15 = vsel %vm275_vm7, %v769_v8, %v771_v9 }
 0x30e   :  { %1046 = vmatprep.subr.bf16.mxu0 %v1045_v12  ;;  %1062 = vmatprep.subr.bf16.mxu1 %v1061_v13 }
 0x30f   :  { %1048 = vmatpush1.bf16.msra.mxu0 %v1047_v7  ;;  %1064 = vmatpush1.bf16.msra.mxu1 %v1063_v44 }
 0x310   :  { %v773_v16 = vpop.permute.xlu1 %772  ;;  %v775_v17 = vpop.permute.xlu0 %774 }
 0x311   :  { %v776_v11 = vsel %vm275_vm7, %v773_v16, %v775_v17  ;;  %v777_v18 = vsel %vm275_vm7, %v771_v9, %v773_v16  ;;  %v779_v10 = vsel %vm275_vm7, %v775_v17, %v769_v8 }
 0x312   :  { %846 = vmatprep.subr.mxu0 %v777_v18  ;;  %917 = vmatprep.subr.mxu1 %v779_v10 }
 0x313   :  { %847 = vmatpush1.msra.mxu0 %v778_v15  ;;  %918 = vmatpush1.msra.mxu1 %v776_v11 }
 0x314   :  { %999 = vmatmul.mubr.msk.f32.vlgmr.msra.gmra.mrb[2].mxu0 %vm492_vm12, %v784_v14  ;;  %1000 = vmatmul.mubr.msk.f32.vlgmr.msra.gmra.mrb[2].mxu1 %vm492_vm12, %v784_v14 }
 0x321   :  { %v825_v19 = vpop.permute.xlu1 %824 }
 0x3e7   :  { %v896_v20 = vpop.f32.mrb[2].mxu0  ;;  %v967_v21 = vpop.f32.mrb[2].mxu1 }
 0x3e8   :  { %v897_v22 = vadd.f32 %v896_v20, %v825_v19  ;;  %v968_v23 = vadd.f32 %v967_v21, %v825_v19  ;;  %v898_v24 = vpop.f32.mrb[3].mxu0  ;;  %v969_v26 = vpop.f32.mrb[3].mxu1 }
 0x3e9   :  { %v899_v27 = vadd.f32 %v898_v24, %v825_v19  ;;  %v970_v42 = vadd.f32 %v969_v26, %v825_v19 }
 0x3ea   :  { %vm972_vm0 = vcmp.gt.f32.partialorder %v897_v22, 0.0  ;;  %v977_v28 = vmul.f32 %v976_v33, %v897_v22  ;;  %vm974_vm1 = vcmp.gt.f32.partialorder %v968_v23, 0.0  ;;  %v979_v29 = vmul.f32 %v976_v33, %v968_v23 }
 0x3eb   :  { %vm973_vm2 = vcmp.gt.f32.partialorder %v899_v27, 0.0  ;;  %v978_v37 = vmul.f32 %v976_v33, %v899_v27  ;;  %vm975_vm3 = vcmp.gt.f32.partialorder %v970_v42, 0.0  ;;  %v980_v30 = vmul.f32 %v976_v33, %v970_v42 }
 0x3ec   :  { %v981_v32 = vsel %vm972_vm0, %v897_v22, %v977_v28  ;;  %v983_v34 = vsel %vm974_vm1, %v968_v23, %v979_v29 }
 0x3ed   :  { %985 = vst [vmem:[%s1755_s8] sm:$0xff] %v981_v32  ;;  %987 = vst [vmem:[%s1755_s8 + $0x10] sm:$0xff] %v983_v34  ;;  %v982_v35 = vsel %vm973_vm2, %v899_v27, %v978_v37  ;;  %v984_v36 = vsel %vm975_vm3, %v970_v42, %v980_v30 }
 0x3ee   :  { %986 = vst [vmem:[%s1755_s8 + $0x8] sm:$0xff] %v982_v35  ;;  %988 = vst [vmem:[%s1755_s8 + $0x18] sm:$0xff] %v984_v36 }
 0x3ef   :  { %993 = vsyncpa [#allocation4], 1 }
 0x3f0   :  { %994 = vsyncpa [#allocation5], 1 }

</bundles_post_ra>
